<compile_context>
chip_gen: v6e
topology: v6e:2x2x1
jax: 0.10.0
libtpu: 0.0.40
codegen_flags: <defaults>
</compile_context>

<pallas_src>
import jax
import jax.numpy as jnp
from jax.experimental import pallas as pl
from jax.experimental.pallas import tpu as pltpu

EPS = 1e-5


def _apn_kernel(x_ref, s_ref, w_ref, b_ref, o_ref):
    # x_ref : (TC, N)     input channel tile
    # s_ref : (S,  N)     style features (full style dim)
    # w_ref : (2, TC, S)  stacked [gamma, beta] halves of the 1x1-conv weight
    # b_ref : (2, TC, 1)  stacked [gamma, beta] biases (f32)
    # o_ref : (TC, N)     output channel tile
    x = x_ref[...].astype(jnp.float32)               # upcast once (VALU, hides under DMA)
    s = s_ref[...]                                   # native dtype feeds the MXU

    # Two MXU matmuls -> gamma/beta produced directly in tile-aligned layout.
    gamma = jnp.dot(w_ref[0], s, preferred_element_type=jnp.float32) + b_ref[0]
    beta = jnp.dot(w_ref[1], s, preferred_element_type=jnp.float32) + b_ref[1]

    # Fused single-pass InstanceNorm stats over the lane axis (biased variance).
    inv_n = jnp.float32(1.0 / x.shape[-1])
    mean = jnp.sum(x, axis=-1, keepdims=True) * inv_n
    ex2 = jnp.sum(x * x, axis=-1, keepdims=True) * inv_n
    var = jnp.maximum(ex2 - mean * mean, 0.0)        # clamp rounding-induced negatives
    inv_std = jax.lax.rsqrt(var + EPS)               # EUP

    # gamma * (x - mean) * inv_std + beta, folded into one scale/shift pass.
    scale = gamma * inv_std
    shift = beta - scale * mean
    o_ref[...] = (scale * x + shift).astype(o_ref.dtype)


def _vmem_capacity_bytes():
    """Per-TensorCore physical VMEM; conservative (v7x) fallback if unknown."""
    try:
        info = pltpu.get_tpu_info()
        cap = getattr(info, "vmem_capacity_bytes", None)
        if cap:
            return int(cap)
    except Exception:
        pass
    return 64 << 20


def _vmem_estimate(tc, S, N, db, n_buf=2):
    """Bytes of VMEM at tile size `tc`: double-buffered blocks + in-kernel f32 temps."""
    x_blk = tc * N * db
    out_blk = tc * N * db
    s_blk = S * N * db
    w_blk = 2 * tc * S * db
    b_blk = 2 * tc * 4
    buffered = n_buf * (x_blk + out_blk + s_blk + w_blk + b_blk)
    internal = 4 * tc * N * 4          # x_f32, gamma, beta, fused scale/shift temp
    return buffered + internal


def _pick_channel_tile(B, C, S, N, db, budget_bytes, *, min_steps=8):
    """Largest channel tile that fits the budget; shrunk (only as far as still-fitting
    candidates allow) until the grid has enough steps to hide DMA latency."""
    sub = max(8, 32 // db)             # sublane tile: 8 f32, 16 bf16, 32 int8/fp8
    cands = [m for m in (1024, 512, 256, 128, 64, 32, 16, 8)
             if m % sub == 0 and m < C]
    cands = sorted(set([C] + cands), reverse=True)   # full-C block is always layout-legal

    fitting = [tc for tc in cands if _vmem_estimate(tc, S, N, db) <= budget_bytes]
    if not fitting:
        # TODO(synk): for very large S*N the style block alone exceeds VMEM; stream style
        # (and/or x) from HBM via pl.ANY + manual double-buffered N-chunks with running
        # sum/sumsq accumulators. Fall back to the smallest legal tile for now.
        return cands[-1]

    # Largest tile that both fits and gives a deep enough pipeline; else largest fitting.
    for tc in fitting:
        if B * pl.cdiv(C, tc) >= min_steps:
            return tc
    return fitting[0]


def adaptive_point_norm(x, style, weight, bias, *, channel_tile=None):
    """x: (B, C, N), style: (B, S, N), weight: (2C, S), bias: (2C,).

    Output dtype == x.dtype (pass bf16 x/style for halved HBM traffic; all
    accumulation / norm math stays f32 inside the kernel).
    """
    B, C, N = x.shape
    S = style.shape[1]
    assert style.shape == (B, S, N)
    assert weight.shape == (2 * C, S) and bias.shape == (2 * C,)

    cdt = x.dtype
    style = style.astype(cdt)
    # Stack gamma/beta halves -> ONE weight DMA + ONE bias DMA per grid step.
    w_stacked = jnp.stack([weight[:C], weight[C:]], axis=0).astype(cdt)          # (2, C, S)
    b_stacked = jnp.stack([bias[:C], bias[C:]], axis=0).astype(jnp.float32)       # (2, C)
    b_stacked = b_stacked.reshape(2, C, 1)

    db = jnp.dtype(cdt).itemsize
    physical_vmem = _vmem_capacity_bytes()
    budget = max(physical_vmem // 2 - (8 << 20), 16 << 20)   # ~24 MiB v7x, ~56 MiB v5e/v6e
    tc = channel_tile or _pick_channel_tile(B, C, S, N, db, budget)
    grid = (B, pl.cdiv(C, tc))

    # Scoped-VMEM limit: actual requirement + headroom, clamped to physical.
    est = _vmem_estimate(tc, S, N, db)
    vmem_limit = int(min(max(int(est * 1.5) + (4 << 20), 32 << 20),
                         physical_vmem - (4 << 20)))

    # Advisory cost: the kernel is HBM-bandwidth bound.
    bytes_accessed = db * (2 * B * C * N + B * S * N) + B * (2 * C * S * db + 2 * C * 4)
    flops = 2 * B * (2 * C) * S * N + 10 * B * C * N
    cost = pl.CostEstimate(flops=flops, transcendentals=B * C,
                           bytes_accessed=bytes_accessed)

    return pl.pallas_call(
        _apn_kernel,
        out_shape=jax.ShapeDtypeStruct((B, C, N), cdt),
        grid_spec=pltpu.PrefetchScalarGridSpec(
            num_scalar_prefetch=0,
            grid=grid,
            in_specs=[
                pl.BlockSpec((None, tc, N), lambda b, c: (b, c, 0)),   # x tile
                pl.BlockSpec((None, S, N), lambda b, c: (b, 0, 0)),    # style (revisited)
                pl.BlockSpec((2, tc, S), lambda b, c: (0, c, 0)),      # stacked weights
                pl.BlockSpec((2, tc, 1), lambda b, c: (0, c, 0)),      # stacked biases
            ],
            out_specs=pl.BlockSpec((None, tc, N), lambda b, c: (b, c, 0)),
        ),
        compiler_params=pltpu.CompilerParams(
            dimension_semantics=("parallel", "parallel"),
            vmem_limit_bytes=vmem_limit),
        cost_estimate=cost,
    )(x, style, w_stacked, b_stacked)


def _reference(x, style, weight, bias):
    # Pure-JAX reference mirroring the PyTorch module (f32 throughout).
    proj = jnp.einsum("os,bsn->bon", weight, style) + bias[None, :, None]
    C = x.shape[1]
    gamma, beta = proj[:, :C], proj[:, C:]
    mean = jnp.mean(x, axis=-1, keepdims=True)
    var = jnp.mean((x - mean) ** 2, axis=-1, keepdims=True)
    normed = (x - mean) / jnp.sqrt(var + EPS)
    return gamma * normed + beta


if __name__ == "__main__":
    B, C, S, N = 2, 4, 8, 128   # batch, in_channel, style_dim, num points

    key = jax.random.PRNGKey(0)
    kx, ks, kw = jax.random.split(key, 3)

    x = jax.random.normal(kx, (B, C, N), dtype=jnp.float32)
    style = jax.random.normal(ks, (B, S, N), dtype=jnp.float32)

    # self.style = Conv1d(style_dim, 2*C, 1); weight.normal_(); bias: first C ones, rest zeros.
    weight = jax.random.normal(kw, (2 * C, S), dtype=jnp.float32)
    bias = jnp.concatenate(
        [jnp.ones((C,), jnp.float32), jnp.zeros((C,), jnp.float32)])

    # f32 path: exact check against the PyTorch-equivalent reference.
    out = jax.block_until_ready(adaptive_point_norm(x, style, weight, bias))
    ref = _reference(x, style, weight, bias)
    assert out.shape == (B, C, N)
    assert jnp.allclose(out, ref, atol=1e-4, rtol=1e-4), "f32 mismatch vs reference"

    # bf16-HBM path (f32 accumulation inside): the mem-bound win on v5e/v6e/v7x.
    x16 = x.astype(jnp.bfloat16)
    s16 = style.astype(jnp.bfloat16)
    out16 = jax.block_until_ready(adaptive_point_norm(x16, s16, weight, bias))
    ref16 = _reference(x16.astype(jnp.float32), s16.astype(jnp.float32),
                       weight.astype(jnp.bfloat16).astype(jnp.float32), bias)
    assert out16.dtype == jnp.bfloat16 and out16.shape == (B, C, N)
    assert jnp.allclose(out16.astype(jnp.float32), ref16, atol=1e-1, rtol=2e-2), \
        "bf16 mismatch vs reference"

    # Multi-tile channel grid: exercises the consolidated (2, tc, S)/(2, tc, 1) per-step
    # parameter DMAs and the channel-tiled output path.
    C2 = 16
    x2 = jax.random.normal(kx, (B, C2, N), dtype=jnp.float32)
    w2 = jax.random.normal(kw, (2 * C2, S), dtype=jnp.float32)
    b2 = jnp.concatenate(
        [jnp.ones((C2,), jnp.float32), jnp.zeros((C2,), jnp.float32)])
    out2 = jax.block_until_ready(
        adaptive_point_norm(x2, style, w2, b2, channel_tile=8))
    ref2 = _reference(x2, style, w2, b2)
    assert jnp.allclose(out2, ref2, atol=1e-4, rtol=1e-4), "tiled mismatch vs reference"

    print("KERNEL_OK")
</pallas_src>

<mosaic_0001>
module attributes {stable_mosaic.version = 11 : i64} {
  func.func @_apn_kernel(%arg0: i32, %arg1: i32, %arg2: memref<1x4x128xf32, #tpu.memory_space<vmem>>, %arg3: memref<1x8x128xf32, #tpu.memory_space<vmem>>, %arg4: memref<2x4x8xf32, #tpu.memory_space<vmem>>, %arg5: memref<2x4x1xf32, #tpu.memory_space<vmem>>, %arg6: memref<1x4x128xf32, #tpu.memory_space<vmem>>) attributes {dimension_semantics = [#tpu.dimension_semantics<parallel>, #tpu.dimension_semantics<parallel>], iteration_bounds = array<i64: 2, 1>, scalar_prefetch = 0 : i64, scratch_operands = 0 : i64, tpu.core_type = #tpu.core_type<tc>, window_params = [{transform_indices = @transform_0, window_bounds = array<i64: 1, 4, 128>}, {transform_indices = @transform_1, window_bounds = array<i64: 1, 8, 128>}, {transform_indices = @transform_2, window_bounds = array<i64: 2, 4, 8>}, {transform_indices = @transform_3, window_bounds = array<i64: 2, 4, 1>}, {transform_indices = @transform_4, window_bounds = array<i64: 1, 4, 128>}]} {
    %c0 = arith.constant 0 : index
    %c0_0 = arith.constant 0 : index
    %c0_1 = arith.constant 0 : index
    %0 = vector.load %arg2[%c0, %c0_0, %c0_1] : memref<1x4x128xf32, #tpu.memory_space<vmem>>, vector<1x4x128xf32>
    %1 = vector.shape_cast %0 : vector<1x4x128xf32> to vector<4x128xf32>
    %c0_2 = arith.constant 0 : index
    %c0_3 = arith.constant 0 : index
    %c0_4 = arith.constant 0 : index
    %2 = vector.load %arg3[%c0_2, %c0_3, %c0_4] : memref<1x8x128xf32, #tpu.memory_space<vmem>>, vector<1x8x128xf32>
    %3 = vector.shape_cast %2 : vector<1x8x128xf32> to vector<8x128xf32>
    %c0_5 = arith.constant 0 : index
    %c0_6 = arith.constant 0 : index
    %c0_7 = arith.constant 0 : index
    %4 = vector.load %arg4[%c0_5, %c0_6, %c0_7] : memref<2x4x8xf32, #tpu.memory_space<vmem>>, vector<1x4x8xf32>
    %5 = vector.shape_cast %4 : vector<1x4x8xf32> to vector<4x8xf32>
    %cst = arith.constant dense<0.000000e+00> : vector<4x128xf32>
    %6 = tpu.matmul %5, %3, %cst {dimension_numbers = #tpu.dot_dimension_numbers<[1], [0], [0], [1], [0, 0, 1, 1], [], []>} : vector<4x8xf32>, vector<8x128xf32>, vector<4x128xf32> -> vector<4x128xf32>
    %c0_8 = arith.constant 0 : index
    %c0_9 = arith.constant 0 : index
    %c0_10 = arith.constant 0 : index
    %7 = vector.load %arg5[%c0_8, %c0_9, %c0_10] : memref<2x4x1xf32, #tpu.memory_space<vmem>>, vector<1x4x1xf32>
    %8 = vector.shape_cast %7 : vector<1x4x1xf32> to vector<4x1xf32>
    %9 = vector.broadcast %8 : vector<4x1xf32> to vector<4x128xf32>
    %10 = arith.addf %6, %9 : vector<4x128xf32>
    %c1 = arith.constant 1 : index
    %c0_11 = arith.constant 0 : index
    %c0_12 = arith.constant 0 : index
    %11 = vector.load %arg4[%c1, %c0_11, %c0_12] : memref<2x4x8xf32, #tpu.memory_space<vmem>>, vector<1x4x8xf32>
    %12 = vector.shape_cast %11 : vector<1x4x8xf32> to vector<4x8xf32>
    %cst_13 = arith.constant dense<0.000000e+00> : vector<4x128xf32>
    %13 = tpu.matmul %12, %3, %cst_13 {dimension_numbers = #tpu.dot_dimension_numbers<[1], [0], [0], [1], [0, 0, 1, 1], [], []>} : vector<4x8xf32>, vector<8x128xf32>, vector<4x128xf32> -> vector<4x128xf32>
    %c1_14 = arith.constant 1 : index
    %c0_15 = arith.constant 0 : index
    %c0_16 = arith.constant 0 : index
    %14 = vector.load %arg5[%c1_14, %c0_15, %c0_16] : memref<2x4x1xf32, #tpu.memory_space<vmem>>, vector<1x4x1xf32>
    %15 = vector.shape_cast %14 : vector<1x4x1xf32> to vector<4x1xf32>
    %16 = vector.broadcast %15 : vector<4x1xf32> to vector<4x128xf32>
    %17 = arith.addf %13, %16 : vector<4x128xf32>
    %cst_17 = arith.constant dense<0.000000e+00> : vector<4xf32>
    %18 = vector.multi_reduction <add>, %1, %cst_17 [1] : vector<4x128xf32> to vector<4xf32>
    %19 = vector.shape_cast %18 : vector<4xf32> to vector<4x1xf32>
    %cst_18 = arith.constant 7.812500e-03 : f32
    %20 = vector.broadcast %cst_18 : f32 to vector<4x1xf32>
    %21 = arith.mulf %19, %20 : vector<4x1xf32>
    %22 = arith.mulf %1, %1 : vector<4x128xf32>
    %cst_19 = arith.constant dense<0.000000e+00> : vector<4xf32>
    %23 = vector.multi_reduction <add>, %22, %cst_19 [1] : vector<4x128xf32> to vector<4xf32>
    %24 = vector.shape_cast %23 : vector<4xf32> to vector<4x1xf32>
    %cst_20 = arith.constant 7.812500e-03 : f32
    %25 = vector.broadcast %cst_20 : f32 to vector<4x1xf32>
    %26 = arith.mulf %24, %25 : vector<4x1xf32>
    %27 = arith.mulf %21, %21 : vector<4x1xf32>
    %28 = arith.subf %26, %27 : vector<4x1xf32>
    %cst_21 = arith.constant 0.000000e+00 : f32
    %29 = vector.broadcast %cst_21 : f32 to vector<4x1xf32>
    %30 = arith.maximumf %28, %29 : vector<4x1xf32>
    %cst_22 = arith.constant 9.99999974E-6 : f32
    %31 = vector.broadcast %cst_22 : f32 to vector<4x1xf32>
    %32 = arith.addf %30, %31 : vector<4x1xf32>
    %33 = math.rsqrt %32 : vector<4x1xf32>
    %34 = vector.broadcast %33 : vector<4x1xf32> to vector<4x128xf32>
    %35 = arith.mulf %10, %34 : vector<4x128xf32>
    %36 = vector.broadcast %21 : vector<4x1xf32> to vector<4x128xf32>
    %37 = arith.mulf %35, %36 : vector<4x128xf32>
    %38 = arith.subf %17, %37 : vector<4x128xf32>
    %39 = arith.mulf %35, %1 : vector<4x128xf32>
    %40 = arith.addf %39, %38 : vector<4x128xf32>
    %c0_23 = arith.constant 0 : index
    %c0_24 = arith.constant 0 : index
    %c0_25 = arith.constant 0 : index
    %41 = vector.load %arg6[%c0_23, %c0_24, %c0_25] : memref<1x4x128xf32, #tpu.memory_space<vmem>>, vector<1x4x128xf32>
    %42 = vector.shape_cast %41 : vector<1x4x128xf32> to vector<4x128xf32>
    %43 = vector.shape_cast %40 : vector<4x128xf32> to vector<1x4x128xf32>
    tpu.vector_store %arg6[%c0_23, %c0_24, %c0_25], %43 {strides = array<i32>} : memref<1x4x128xf32, #tpu.memory_space<vmem>>, vector<1x4x128xf32>,
    return
  }
  func.func @transform_0(%arg0: i32, %arg1: i32) -> (i32, i32, i32) {
    %c0_i32 = arith.constant 0 : i32
    %c0_i32_0 = arith.constant 0 : i32
    return %arg0, %arg1, %c0_i32 : i32, i32, i32
  }
  func.func @transform_1(%arg0: i32, %arg1: i32) -> (i32, i32, i32) {
    %c0_i32 = arith.constant 0 : i32
    %c0_i32_0 = arith.constant 0 : i32
    %c0_i32_1 = arith.constant 0 : i32
    return %arg0, %c0_i32, %c0_i32_0 : i32, i32, i32
  }
  func.func @transform_2(%arg0: i32, %arg1: i32) -> (i32, i32, i32) {
    %c0_i32 = arith.constant 0 : i32
    %c0_i32_0 = arith.constant 0 : i32
    %c0_i32_1 = arith.constant 0 : i32
    return %c0_i32, %arg1, %c0_i32_0 : i32, i32, i32
  }
  func.func @transform_3(%arg0: i32, %arg1: i32) -> (i32, i32, i32) {
    %c0_i32 = arith.constant 0 : i32
    %c0_i32_0 = arith.constant 0 : i32
    %c0_i32_1 = arith.constant 0 : i32
    return %c0_i32, %arg1, %c0_i32_0 : i32, i32, i32
  }
  func.func @transform_4(%arg0: i32, %arg1: i32) -> (i32, i32, i32) {
    %c0_i32 = arith.constant 0 : i32
    %c0_i32_0 = arith.constant 0 : i32
    return %arg0, %arg1, %c0_i32 : i32, i32, i32
  }
}

</mosaic_0001>

<bundles_post_ra>
// kernel: tpu_custom_call.1
= control target key start
LH: loop header
LB: loop body
LE: loop exit
PB: predicated region body
PF: predicated region fallthrough
CT: control target
= control target key end

     0   :  { %s1084_s0 = inlined_call_operand.vmem [shape: f32[2,4,128], index: 0, kind: input, shape index: {}]   ;;  %s1085_s1 = inlined_call_operand.hbm [shape: f32[2,8,128], index: 1, kind: input, shape index: {}]   ;;  %s1086_s2 = inlined_call_operand.hbm [shape: f32[2,4,8], index: 2, kind: input, shape index: {}]   ;;  %s1087_s3 = inlined_call_operand.vmem [shape: f32[2,4,1], index: 3, kind: input, shape index: {}]   ;;  %s1088_s4 = inlined_call_operand.hbm [shape: f32[2,4,128], index: 4, kind: output, shape index: {}]  }
   0x1   :  { %1090 = sst [smem:[#allocation11_spill]] %s1086_s2 }
   0x2   :  { %9 = vsyncpa [#allocation3], 0 }
   0x3   :  { %11 = vsyncpa [#allocation3 + $0x1], 0 }
   0x4   :  { %12 = vsyncpa [#allocation6], 0 }
   0x5   :  { %13 = vsyncpa [#allocation4], 0 }
   0x6   :  { %15 = vsyncpa [#allocation4 + $0x1], 0  ;;  %s905_s15 = smov 0   ;;  %s907_s16 = smov 0  }
   0x7   :  { %s909_s17 = smov 0   ;;  %s911_s18 = smov 0  }
   0x8   :  { %s913_s19 = smov 0   ;;  %s915_s20 = smov 0  }
   0x9 LB: > { %s616_s21 = sadd.s32 4294967295, %s870_s20   ;;  %s617_s22 = sadd.s32 4294967294, %s870_s20   ;;  %s870_s20 = sphi %s915_s20, %s21_s20   ;;  %s866_s19 = sphi %s913_s19, %s1108_s19   ;;  %s862_s18 = sphi %s911_s18, %s1107_s18   ;;  %s858_s17 = sphi %s909_s17, %s1106_s17   ;;  %s854_s16 = sphi %s907_s16, %s1105_s16   ;;  %s850_s15 = sphi %s905_s15, %s1104_s15  }
   0xa   : > { %p81_p0 = scmp.ne.s32.totalorder %s854_s16, %s850_s15  ;;  %p939_p1 = scmp.eq.s32.totalorder %s616_s21, 0 }
   0xb   : > { %p943_p2 = scmp.eq.s32.totalorder %s616_s21, 1  ;;  %p165_p3 = scmp.eq.s32.totalorder %s617_s22, 1 }
   0xc   : > { %p949_p4 = por %p939_p1, %p81_p0  ;;  %p618_p5 = scmp.ge.s32.totalorder %s870_s20, 1 }
   0xd   : > { %p954_p6 = por %p165_p3, %p81_p0  ;;  %p172_p7 = scmp.lt.s32.totalorder %s870_s20, 3 }
   0xe   : > { %s1093_s25 = scalar_select %p949_p4, 1, 0 }
   0xf   : > { %s1094_s26 = scalar_select %p954_p6, 1, 0 }
  0x10   : > { %p959_p8 = pnand %p618_p5, %p172_p7  ;;  %s872_s28 = smov [#allocation5]  }
  0x11   : > { %s186_s29 = sshll.u32 %s872_s28, 4  ;;  %s33_s5 = sadd.s32 1, %s866_s19  ;;  %s187_s29 = int_to_ptr.vmem [resolvable:$true] %s186_s29 }
  0x12   : > { %p658_p9 = pneg %p959_p8  ;;  %s743_s6 = scalar_lea.vmem %s187_s29, 128 }
  0x13   : > { %p744_p13 = scmp.ne.s32.totalorder %s187_s29, %s743_s6  ;;  %p751_p5 = scmp.lt.s32.totalorder %s187_s29, %s187_s29 }
  0x14   : > { %p968_p11 = pnand %p658_p9, %p939_p1  ;;  %p752_p7 = scmp.lt.s32.totalorder %s743_s6, %s743_s6 }
  0x16   : > { %p734_p12 = pneg %p968_p11  ;;  %p753_p6 = por %p752_p7, %p751_p5 }
  0x18   : > { %p746_p0 = pnand %p744_p13, %p734_p12 }
  0x1a   : > { %p747_p3 = pneg %p746_p0 }
  0x1c   : > { %p754_p4 = pnand %p753_p6, %p747_p3 }
  0x1e   : > { %757 = shalt.err (!%p754_p4)
}
  0x1f   : > { %s873_s7 = smov 64   ;;  %s874_s8 = smov 4  }
  0x20   : > { %s1097_s2 = sld [smem:[#allocation11_spill]]  ;;  %p35_p6 = scmp.ge.s32.totalorder %s33_s5, 2 }
  0x21   : > { %s68_s11 = sadd.s32 1, %s858_s17  ;;  %p75_p4 = scmp.ne.s32.totalorder %s858_s17, %s854_s16 }
  0x22   : > { %p76_p9 = scmp.eq.s32.totalorder %s870_s20, 0  ;;  %s1110_s5 = smov (%p35_p6, %s33_s5), 0 }
  0x23   : > { %p992_p13 = por %p943_p2, %p75_p4  ;;  %s65_s14 = ssub.s32 %s866_s19, %s1110_s5 }
  0x24   : > { %p986_p12 = por %p76_p9, %p75_p4  ;;  %p671_p0 = scmp.lt.s32.totalorder %s870_s20, 2 }
  0x25   : > { %s217_s21 = sand.u32 1, %s858_s17  }
  0x26   : > { %661 = dma.hbm_to_vmem [thread:$0]  (!%p968_p11), %s1097_s2, 128, %s187_s29, [#allocation6], %s873_s7, %s873_s7, %s874_s8  }
  0x27   : > { %p66_p11 = scmp.eq.s32.totalorder %s65_s14, 0  ;;  %s622_s22 = sshll.u32 %s217_s21, 3 }
  0x28   : > { %s623_s29 = sshll.u32 %s866_s19, 7  ;;  %s221_s8 = scalar_lea.vmem [#allocation2], %s622_s22 }
  0x29   : > { %s1001_s28 = scalar_select %p66_p11, %s858_s17, %s68_s11  }
  0x2a   : > { %s226_s7 = scalar_lea.hbm %s1085_s1, %s623_s29  ;;  %s228_s9 = sshll.u32 %s221_s8, 4  ;;  %s229_s9 = int_to_ptr.vmem [resolvable:$true] %s228_s9 }
  0x2b   : > { %p1009_p2 = pnand %p671_p0, %p986_p12  ;;  %s218_s10 = scalar_lea.sflag [#allocation3], %s217_s21 }
  0x2c   : > { %s771_s14 = scalar_lea.vmem %s229_s9, 128  ;;  %s875_s11 = smov [#allocation2]  }
  0x2d   : > { %p760_p3 = pneg %p1009_p2  ;;  %p772_p5 = scmp.ne.s32.totalorder %s229_s9, %s771_s14 }
  0x2e   : > { %s776_s2 = sshll.u32 %s875_s11, 4  ;;  %s777_s2 = int_to_ptr.vmem [resolvable:$false] %s776_s2 }
  0x2f   : > { %p774_p7 = pnand %p772_p5, %p760_p3  ;;  %s778_s29 = scalar_lea.vmem %s777_s2, 256 }
  0x30   : > { %p779_p4 = scmp.lt.s32.totalorder %s229_s9, %s777_s2  ;;  %p780_p9 = scmp.lt.s32.totalorder %s778_s29, %s771_s14 }
  0x31   : > { %p775_p6 = pneg %p774_p7 }
  0x32   : > { %p781_p11 = por %p780_p9, %p779_p4 }
  0x34   : > { %p782_p10 = pnand %p781_p11, %p775_p6 }
  0x36   : > { %785 = shalt.err (!%p782_p10)
}
  0x37   : > { %665 = dma.hbm_to_vmem [thread:$0]  (!%p1009_p2), %s226_s7, 128, %s229_s9, %s218_s10  }
  0x38   : > { %237 = sbr.rel (%p959_p8) target bundleno = 285 (0x11d), region = 36  ;;  %s1020_s12 = sand.u32 (!%p959_p8), 1, %s854_s16  }
  0x39   : > { %s625_s21 = sshll.u32 (!%p959_p8), %s1020_s12, 3  ;;  %s240_s22 = scalar_lea.sflag (!%p959_p8), [#allocation3], %s1020_s12 }
  0x3a   : > { %s243_s30 = scalar_lea.vmem (!%p959_p8), [#allocation2], %s625_s21  ;;  %p1101_p12 = scmp.ne.s32.totalorder (!%p959_p8), %s1093_s25, 0 }
  0x3d   : > { %837 = dma.done.wait (%p1101_p12), %s240_s22, 128  }
  0x3e   : > { %839 = vsyncadd (%p1101_p12), %s240_s22, 4294967168 }
  0x3f   : > { %841 = dma.done.wait (%p939_p1), [#allocation6], 128  }
  0x40   : > { %843 = vsyncadd (%p939_p1), [#allocation6], 4294967168  ;;  %p283_p8 = scmp.lt.s32.totalorder %s862_s18, 1  ;;  %v876_v0 = vmov 0.0   ;;  %vm877_vm0 = vmmov 0   ;;  %v878_v1 = vmov 0  }
  0x41   : > { %640 = vmatprep.subr.mxu0 %v876_v0  ;;  %645 = vmatprep.subr.mxu1 %v876_v0  ;;  %vm303_vm1 = vcmask 64512   ;;  %vm459_vm2 = vcmask 1043456   ;;  %v295_v2 = vld [vmem:[%s243_s30] sm:$0xff]  ;;  %v296_v3 = vld [vmem:[#allocation5] sm:$0xf]  ;;  %s627_s10 = sshll.u32 %s1020_s12, 2 }
  0x42   : > { %642 = vmatprep.mubr.msk.f32.mxu0 %vm877_vm0, %v876_v0  ;;  %647 = vmatprep.mubr.msk.f32.mxu1 %vm877_vm0, %v876_v0  ;;  %s284_s2 = scalar_select %p283_p8, %s862_s18, 1  ;;  %v378_v4 = vld [vmem:[#allocation5 + $0x4] sm:$0xf]  ;;  %v297_v6 = vld [vmem:[%s1087_s3] sm:$0xf] }
  0x43   : > { %728 = vset.pattern.permute.xlu1 %v878_v1  ;;  %729 = vset.pattern.permute.xlu0 %v878_v1  ;;  %v630_v10 = vld [vmem:[%s1087_s3 + $0x4] sm:$0xf]  ;;  %s633_s14 = sshll.u32 %s862_s18, 6  ;;  %s282_s11 = scalar_lea.vmem [#allocation7], %s627_s10 }
  0x44   : > { %s628_s25 = sshll.u32 %s284_s2, 2  ;;  %641 = vmatpush3.msra.mxu0 %v295_v2  ;;  %646 = vmatpush3.msra.mxu1 %v295_v2  ;;  %s495_s29 = sshll.u32 %s282_s11, 4  ;;  %s496_s29 = int_to_ptr.vmem [resolvable:$true] %s495_s29 }
  0x45   : > { %s289_s7 = scalar_lea.vmem %s1084_s0, %s628_s25  ;;  %643 = vmatmul.mubr.msk.f32.vlgmr.msra.gmra.mxu0 %vm303_vm1, %v296_v3  ;;  %648 = vmatmul.mubr.msk.f32.vlgmr.msra.gmra.mxu1 %vm303_vm1, %v378_v4  ;;  %s493_s30 = scalar_lea.hbm %s1088_s4, %s633_s14 }
  0x46   : > { %v294_v5 = vld [vmem:[%s289_s7] sm:$0xf]  ;;  %300 = vperm.xlu1 %728, %v297_v6   ;;  %s481_s2 = scalar_lea.sflag [#allocation4], %s1020_s12  ;;  %s786_s25 = scalar_lea.vmem %s496_s29, 64 }
  0x47   : > { %v460_v7 = vsel %vm459_vm2, %v294_v5, 0.0  ;;  %v464_v8 = vmul.f32 %v294_v5, %v294_v5  ;;  %p787_p1 = scmp.ne.s32.totalorder %s496_s29, %s786_s25  ;;  %s879_s27 = smov [#allocation7]  }
  0x48   : > { %461 = vadd.xlane.f32.xlu0 %v460_v7  ;;  %s790_s6 = sshll.u32 %s879_s27, 4  ;;  %s791_s6 = int_to_ptr.vmem [resolvable:$false] %s790_s6 }
  0x49   : > { %v465_v9 = vsel %vm459_vm2, %v464_v8, 0.0  ;;  %p788_p10 = pnand %p787_p1, %p992_p13  ;;  %s792_s18 = scalar_lea.vmem %s791_s6, 128 }
  0x4a   : > { %383 = vperm.xlu1 %728, %v630_v10   ;;  %p793_p2 = scmp.lt.s32.totalorder %s496_s29, %s791_s6  ;;  %p794_p3 = scmp.lt.s32.totalorder %s792_s18, %s786_s25 }
  0x4b   : > { %p789_p0 = pneg %p788_p10 }
  0x4c   : > { %466 = vadd.xlane.f32.xlu0 %v465_v9  ;;  %p795_p5 = por %p794_p3, %p793_p2 }
  0x4e   : > { %p796_p7 = pnand %p795_p5, %p789_p0 }
  0xc1   : > { %v301_v19 = vpop.permute.xlu1 %300 }
  0xc5   : > { %v384_v22 = vpop.permute.xlu1 %383 }
  0xd1   : > { %v462_v11 = vpop.xlane.xlu0 %461 }
  0xd2   : > { %v463_v12 = vmul.f32 0.0078125, %v462_v11 }
  0xd4   : > { %v469_v14 = vmul.f32 %v463_v12, %v463_v12 }
  0xd5   : > { %v467_v13 = vpop.xlane.xlu0 %466 }
  0xd6   : > { %v468_v15 = vmul.f32 0.0078125, %v467_v13 }
  0xd8   : > { %v470_v16 = vsub.f32 %v468_v15, %v469_v14 }
  0xda   : > { %v471_v17 = vmax.f32 %v470_v16, 0.0 }
  0xdc   : > { %v472_v18 = vadd.f32 1e-05, %v471_v17 }
  0xde   : > { %730 = vrsqrt.f32 %v472_v18 }
  0xeb   : > { %v731_v24 = vpop.eup %730 }
 0x105   : > { %v373_v20 = vpop.f32.mrf.mxu0  ;;  %v455_v21 = vpop.f32.mrf.mxu1 }
 0x106   : > { %v374_v23 = vadd.f32 %v373_v20, %v301_v19  ;;  %v456_v28 = vadd.f32 %v455_v21, %v384_v22 }
 0x107   : > { %v644_v25 = vpop.f32.mrf.mxu0  ;;  %v649_v26 = vpop.f32.mrf.mxu1 }
 0x108   : > { %v474_v27 = vmul.f32 %v731_v24, %v374_v23 }
 0x10a   : > { %v475_v29 = vmul.f32 %v474_v27, %v463_v12  ;;  %v477_v30 = vmul.f32 %v474_v27, %v294_v5 }
 0x10c   : > { %v476_v31 = vsub.f32 %v456_v28, %v475_v29 }
 0x10e   : > { %v478_v32 = vadd.f32 %v477_v30, %v476_v31 }
 0x110   : > { %479 = vst [vmem:[%s282_s11] sm:$0xf] %v478_v32 }
 0x111   : > { %799 = shalt.err (!%p796_p7)
}
 0x112   : > { %s800_s7 = scalar_lea.hbm %s493_s30, 64  ;;  %s804_s8 = scalar_lea.hbm %s1088_s4, 128 }
 0x113   : > { %p801_p6 = scmp.ne.s32.totalorder %s493_s30, %s800_s7  ;;  %p805_p11 = scmp.lt.s32.totalorder %s493_s30, %s1088_s4 }
 0x114   : > { %p806_p12 = scmp.lt.s32.totalorder %s804_s8, %s800_s7 }
 0x115   : > { %p802_p4 = pnand %p801_p6, %p992_p13 }
 0x116   : > { %p807_p8 = por %p806_p12, %p805_p11 }
 0x117   : > { %p803_p9 = pneg %p802_p4 }
 0x119   : > { %p808_p1 = pnand %p807_p8, %p803_p9 }
 0x11b   : > { %811 = shalt.err (!%p808_p1)
}
 0x11c   : > { %656 = dma.vmem_to_hbm [thread:$0]  (%p992_p13), %s496_s29, 64, %s493_s30, %s481_s2  }
 0x11d PF: > { %s507_s10 = sand.u32 1, %s850_s15   ;;  %p1102_p10 = scmp.ne.s32.totalorder %s1094_s26, 0 }
 0x11e   : > { %p1103_p0 = scmp.ge.s32.totalorder %s870_s20, 2  ;;  %s508_s14 = scalar_lea.sflag [#allocation4], %s507_s10 }
 0x120   : > { %p667_p2 = pnand %p1103_p0, %p1102_p10 }
 0x122   : > { %p668_p3 = pneg %p667_p2 }
 0x124   : > { %845 = dma.done.wait (%p668_p3), %s508_s14, 64  }
 0x125   : > { %847 = vsyncadd (%p668_p3), %s508_s14, 4294967232  ;;  %s21_s20 = sadd.s32 1, %s870_s20   ;;  %s1104_s15 = smov %s854_s16 }
 0x126   : > { %p18_p5 = scmp.ge.s32.totalorder %s21_s20, 4   ;;  %s1105_s16 = smov %s858_s17 }
 0x127   : > { %s1106_s17 = smov %s1001_s28  ;;  %s1107_s18 = smov %s866_s19 }
 0x128   : > { %s1108_s19 = smov %s1110_s5  ;;  %20 = sbr.rel (!%p18_p5) target bundleno = 9 (0x9), region = 94 }
 0x12d   :  { %513 = vsyncpa [#allocation3], 1 }
 0x12e   :  { %515 = vsyncpa [#allocation3 + $0x1], 1 }
 0x12f   :  { %516 = vsyncpa [#allocation6], 1 }
 0x130   :  { %517 = vsyncpa [#allocation4], 1 }
 0x131   :  { %519 = vsyncpa [#allocation4 + $0x1], 1 }

</bundles_post_ra>
